<compile_context>
chip_gen: v7x
topology: tpu7x:2x2x1
jax: 0.10.0
libtpu: 0.0.40
codegen_flags: <defaults>
</compile_context>

<pallas_src>
import functools
import math

import jax
import jax.numpy as jnp
from jax import lax
from jax.experimental import pallas as pl
from jax.experimental.pallas import tpu as pltpu


def _round_up(x: int, m: int) -> int:
    return ((x + m - 1) // m) * m


def _layernorm_kernel(x_ref, alpha_ref, bias_ref, o_ref, *, eps: float,
                      features: int, f_pad: int):
    x = x_ref[...].astype(jnp.float32)          # (tr, f_pad)
    alpha = alpha_ref[...]                      # (1, f_pad) f32, VMEM-resident
    bias = bias_ref[...]                        # (1, f_pad) f32

    # Padded lanes of x are zero, so a full-lane sum equals the real-lane sum.
    mean = jnp.sum(x, axis=-1, keepdims=True) / features            # (tr, 1)
    diff = x - mean
    sq = diff * diff
    if f_pad != features:
        # Mask the padded lanes out of the variance accumulation only.
        lane = lax.broadcasted_iota(jnp.int32, (1, f_pad), 1)
        sq = jnp.where(lane < features, sq, 0.0)
    # torch.std is the unbiased estimator (divides by N-1; NaN when N == 1).
    var = jnp.sum(sq, axis=-1, keepdims=True) / (features - 1)
    std = jnp.sqrt(var)
    # Narrow (tr, 1) reciprocal instead of a full-width divide; the remaining
    # wide work is only VPU multiplies/adds. eps added to std (not var) on
    # purpose to match the reference module.
    inv = pl.reciprocal(std + eps, approx=False)                     # (tr, 1)
    o_ref[...] = ((diff * inv) * alpha + bias).astype(o_ref.dtype)
    # TODO(synk): on v7x, if profiling shows the VALU slot saturating for bf16
    # inputs, offload the two row-sum reductions to the (idle) MXU via jnp.dot
    # with a resident ones operand instead of lane reductions.


def _tpu_vmem_and_cores():
    """Physical VMEM bytes and TensorCores-per-chip, with safe fallbacks."""
    vmem_cap = 64 << 20   # conservative fallback = v7x per-TC VMEM
    cores = 1
    try:
        info = pltpu.get_tpu_info()
        vmem_cap = int(getattr(info, "vmem_capacity_bytes", vmem_cap))
    except Exception:
        pass
    try:
        kind = jax.devices()[0].device_kind.lower()
        # Megacore / dual-TensorCore chips benefit from a balanced grid.
        if ("v3" in kind) or ("v4" in kind) or ("v5p" in kind) or ("7" in kind):
            cores = 2
    except Exception:
        pass
    return vmem_cap, cores


def _pick_row_tile(rows: int, f_pad: int, dtype, max_row_tile: int,
                   vmem_budget: int, num_cores: int) -> int:
    """Largest aligned row tile fitting the per-generation VMEM budget."""
    itemsize = jnp.dtype(dtype).itemsize
    # Sublane packing: f32 -> 8-row alignment, bf16 -> 16, int8/fp8 -> 32.
    align = 8 * max(1, 4 // itemsize)
    # Per-row VMEM footprint: double-buffered input + output blocks plus
    # ~4 f32-sized temporaries (x_f32, diff, diff^2, pre-cast out).
    per_row = f_pad * (2 * itemsize + 2 * itemsize + 4 * 4)
    cap = max(align, (vmem_budget // max(per_row, 1)) // align * align)

    max_row_tile = max(align, (max_row_tile // align) * align)
    tile = min(max_row_tile, cap, _round_up(rows, align))

    # On dual-TensorCore chips the "parallel" row axis is sharded across
    # cores: round the number of grid blocks up to a multiple of the core
    # count so neither core idles. Single-core chips keep the biggest tile.
    if num_cores > 1 and rows > num_cores * align:
        nblocks = pl.cdiv(rows, tile)
        nblocks = num_cores * pl.cdiv(nblocks, num_cores)
        tile = max(align, min(tile, _round_up(pl.cdiv(rows, nblocks), align)))
    return tile


def layer_normalization(x: jax.Array, alpha: jax.Array, bias: jax.Array,
                        eps: float = 1e-6, *,
                        max_row_tile: int | None = None) -> jax.Array:
    """Applies PyTorch-style LayerNormalization over the last axis of x."""
    orig_shape = x.shape
    features = orig_shape[-1]
    assert alpha.shape == (features,)
    assert bias.shape == (features,)

    rows = math.prod(orig_shape[:-1]) if len(orig_shape) > 1 else 1
    f_pad = _round_up(features, 128)   # lane-dense feature width

    x2d = x.reshape(rows, features)
    alpha2d = alpha.reshape(1, features).astype(jnp.float32)
    bias2d = bias.reshape(1, features).astype(jnp.float32)
    if f_pad != features:
        # Zero-pad the lane dim so every load/store is full-lane; padded lanes
        # are masked out of the variance and sliced off below.
        # TODO(synk): for production narrow-F hot paths, repack 128//F rows
        # side-by-side in the lane dim (segmented in-lane reduction) to avoid
        # the extra padded-HBM traffic of this simple pad-and-slice scheme.
        pad = ((0, 0), (0, f_pad - features))
        x2d = jnp.pad(x2d, pad)
        alpha2d = jnp.pad(alpha2d, pad)
        bias2d = jnp.pad(bias2d, pad)

    vmem_cap, num_cores = _tpu_vmem_and_cores()
    vmem_budget = int(vmem_cap * 0.70)          # tile-sizing budget
    vmem_limit = int(vmem_cap * 0.85)           # scoped VMEM limit for Mosaic
    if max_row_tile is None:
        max_row_tile = 2048 if vmem_cap >= (100 << 20) else 1024

    row_tile = _pick_row_tile(rows, f_pad, x.dtype, max_row_tile,
                              vmem_budget, num_cores)
    grid = (pl.cdiv(rows, row_tile),)   # ragged last block handled by Pallas

    kernel = functools.partial(_layernorm_kernel, eps=eps, features=features,
                               f_pad=f_pad)

    out = pl.pallas_call(
        kernel,
        out_shape=jax.ShapeDtypeStruct((rows, f_pad), x.dtype),
        grid_spec=pltpu.PrefetchScalarGridSpec(
            num_scalar_prefetch=0,
            grid=grid,
            in_specs=[
                # TODO(synk): add pipeline_mode=pl.Buffered(3) here only if an
                # xprof trace shows exposed DMA at grid-step boundaries.
                pl.BlockSpec((row_tile, f_pad), lambda i: (i, 0)),
                pl.BlockSpec((1, f_pad), lambda i: (0, 0)),
                pl.BlockSpec((1, f_pad), lambda i: (0, 0)),
            ],
            out_specs=pl.BlockSpec((row_tile, f_pad), lambda i: (i, 0)),
        ),
        compiler_params=pltpu.CompilerParams(
            dimension_semantics=("parallel",),
            vmem_limit_bytes=vmem_limit),
    )(x2d, alpha2d, bias2d)

    if f_pad != features:
        out = out[:, :features]
    return out.reshape(orig_shape)


if __name__ == "__main__":
    key = jax.random.PRNGKey(0)
    batch, seq, features = 2, 8, 32
    x = jax.random.normal(key, (batch, seq, features), dtype=jnp.float32)

    # Deterministic parameter init matching nn.Parameter(torch.ones/zeros).
    alpha = jnp.ones((features,), dtype=jnp.float32)
    bias = jnp.zeros((features,), dtype=jnp.float32)

    out = layer_normalization(x, alpha, bias, eps=1e-6)
    out = jax.block_until_ready(out)

    # Reference check in plain JAX (unbiased std, matching torch.std).
    mean = jnp.mean(x, axis=-1, keepdims=True)
    std = jnp.sqrt(jnp.sum((x - mean) ** 2, axis=-1, keepdims=True)
                   / (features - 1))
    ref = alpha * (x - mean) / (std + 1e-6) + bias
    assert jnp.allclose(out, ref, atol=1e-5, rtol=1e-5), "mismatch vs reference"

    print("KERNEL_OK")
</pallas_src>

<mosaic_0001>
module attributes {stable_mosaic.version = 11 : i64} {
  func.func @_layernorm_kernel(%arg0: i32, %arg1: memref<16x128xf32, #tpu.memory_space<vmem>>, %arg2: memref<1x128xf32, #tpu.memory_space<vmem>>, %arg3: memref<1x128xf32, #tpu.memory_space<vmem>>, %arg4: memref<16x128xf32, #tpu.memory_space<vmem>>) attributes {dimension_semantics = [#tpu.dimension_semantics<parallel>], iteration_bounds = array<i64: 1>, scalar_prefetch = 0 : i64, scratch_operands = 0 : i64, tpu.core_type = #tpu.core_type<tc>, window_params = [{transform_indices = @transform_0, window_bounds = array<i64: 16, 128>}, {pipeline_mode = #tpu.pipeline_mode<synchronous>, transform_indices = @transform_1, window_bounds = array<i64: 1, 128>}, {pipeline_mode = #tpu.pipeline_mode<synchronous>, transform_indices = @transform_2, window_bounds = array<i64: 1, 128>}, {transform_indices = @transform_3, window_bounds = array<i64: 16, 128>}]} {
    %c0 = arith.constant 0 : index
    %c0_0 = arith.constant 0 : index
    %0 = vector.load %arg1[%c0, %c0_0] : memref<16x128xf32, #tpu.memory_space<vmem>>, vector<16x128xf32>
    %c0_1 = arith.constant 0 : index
    %c0_2 = arith.constant 0 : index
    %1 = vector.load %arg2[%c0_1, %c0_2] : memref<1x128xf32, #tpu.memory_space<vmem>>, vector<1x128xf32>
    %c0_3 = arith.constant 0 : index
    %c0_4 = arith.constant 0 : index
    %2 = vector.load %arg3[%c0_3, %c0_4] : memref<1x128xf32, #tpu.memory_space<vmem>>, vector<1x128xf32>
    %cst = arith.constant dense<0.000000e+00> : vector<16xf32>
    %3 = vector.multi_reduction <add>, %0, %cst [1] : vector<16x128xf32> to vector<16xf32>
    %4 = vector.shape_cast %3 : vector<16xf32> to vector<16x1xf32>
    %cst_5 = arith.constant 3.200000e+01 : f32
    %5 = vector.broadcast %cst_5 : f32 to vector<16x1xf32>
    %6 = arith.divf %4, %5 : vector<16x1xf32>
    %7 = vector.broadcast %6 : vector<16x1xf32> to vector<16x128xf32>
    %8 = arith.subf %0, %7 : vector<16x128xf32>
    %9 = arith.mulf %8, %8 : vector<16x128xf32>
    %10 = tpu.iota {dimensions = array<i32: 1>} : vector<1x128xi32>
    %c32_i32 = arith.constant 32 : i32
    %11 = vector.broadcast %c32_i32 : i32 to vector<1x128xi32>
    %12 = arith.cmpi slt, %10, %11 : vector<1x128xi32>
    %cst_6 = arith.constant 0.000000e+00 : f32
    %13 = vector.shape_cast %12 : vector<1x128xi1> to vector<1x128xi1>
    %14 = vector.broadcast %13 : vector<1x128xi1> to vector<16x128xi1>
    %15 = vector.broadcast %cst_6 : f32 to vector<16x128xf32>
    %16 = arith.select %14, %9, %15 : vector<16x128xi1>, vector<16x128xf32>
    %cst_7 = arith.constant dense<0.000000e+00> : vector<16xf32>
    %17 = vector.multi_reduction <add>, %16, %cst_7 [1] : vector<16x128xf32> to vector<16xf32>
    %18 = vector.shape_cast %17 : vector<16xf32> to vector<16x1xf32>
    %cst_8 = arith.constant 3.100000e+01 : f32
    %19 = vector.broadcast %cst_8 : f32 to vector<16x1xf32>
    %20 = arith.divf %18, %19 : vector<16x1xf32>
    %21 = math.sqrt %20 : vector<16x1xf32>
    %cst_9 = arith.constant 9.99999997E-7 : f32
    %22 = vector.broadcast %cst_9 : f32 to vector<16x1xf32>
    %23 = arith.addf %21, %22 : vector<16x1xf32>
    %24 = tpu.reciprocal %23 : vector<16x1xf32> -> vector<16x1xf32>
    %25 = vector.broadcast %24 : vector<16x1xf32> to vector<16x128xf32>
    %26 = arith.mulf %8, %25 : vector<16x128xf32>
    %27 = vector.broadcast %1 : vector<1x128xf32> to vector<16x128xf32>
    %28 = arith.mulf %26, %27 : vector<16x128xf32>
    %29 = vector.broadcast %2 : vector<1x128xf32> to vector<16x128xf32>
    %30 = arith.addf %28, %29 : vector<16x128xf32>
    %c0_10 = arith.constant 0 : index
    %c0_11 = arith.constant 0 : index
    %31 = vector.load %arg4[%c0_10, %c0_11] : memref<16x128xf32, #tpu.memory_space<vmem>>, vector<16x128xf32>
    tpu.vector_store %arg4[%c0_10, %c0_11], %30 {strides = array<i32>} : memref<16x128xf32, #tpu.memory_space<vmem>>, vector<16x128xf32>,
    return
  }
  func.func @transform_0(%arg0: i32) -> (i32, i32) {
    %c0_i32 = arith.constant 0 : i32
    %c0_i32_0 = arith.constant 0 : i32
    return %arg0, %c0_i32 : i32, i32
  }
  func.func @transform_1(%arg0: i32) -> (i32, i32) {
    %c0_i32 = arith.constant 0 : i32
    %c0_i32_0 = arith.constant 0 : i32
    %c0_i32_1 = arith.constant 0 : i32
    return %c0_i32, %c0_i32_0 : i32, i32
  }
  func.func @transform_2(%arg0: i32) -> (i32, i32) {
    %c0_i32 = arith.constant 0 : i32
    %c0_i32_0 = arith.constant 0 : i32
    %c0_i32_1 = arith.constant 0 : i32
    return %c0_i32, %c0_i32_0 : i32, i32
  }
  func.func @transform_3(%arg0: i32) -> (i32, i32) {
    %c0_i32 = arith.constant 0 : i32
    %c0_i32_0 = arith.constant 0 : i32
    return %arg0, %c0_i32 : i32, i32
  }
}

</mosaic_0001>

<bundles_post_ra>
// kernel: tpu_custom_call.1
= control target key start
LH: loop header
LB: loop body
LE: loop exit
PB: predicated region body
PF: predicated region fallthrough
CT: control target
= control target key end

     0   :  { %8 = vsyncpa [#allocation3], 0  ;;  %s235_s0 = inlined_call_operand.hbm [shape: f32[16,128], index: 0, kind: input, shape index: {}]   ;;  %s236_s1 = inlined_call_operand.vmem [shape: f32[1,128], index: 1, kind: input, shape index: {}]   ;;  %s237_s2 = inlined_call_operand.vmem [shape: f32[1,128], index: 2, kind: input, shape index: {}]   ;;  %s238_s3 = inlined_call_operand.hbm [shape: f32[16,128], index: 3, kind: output, shape index: {}]  }
   0x1   :  { %9 = vsyncpa [#allocation4], 0  ;;  %s175_s12 = smov [#allocation2]   ;;  %s127_s16 = scalar_lea.hbm %s235_s0, 256 }
   0x2   :  { %s15_s13 = sshll.u32 %s175_s12, 4  ;;  %p128_p0 = scmp.ne.s32.totalorder %s235_s0, %s127_s16  ;;  %s16_s13 = int_to_ptr.vmem [resolvable:$true] %s15_s13 }
   0x3   :  { %p131_p1 = scmp.lt.u32.totalorder %s127_s16, %s235_s0 }
   0x5   :  { %p133_p2 = pnand %p131_p1, %p128_p0 }
   0x7   :  { %136 = shalt.err (!%p133_p2)
}
   0x8   :  { %s137_s21 = scalar_lea.vmem %s16_s13, 256  ;;  %p142_p4 = scmp.lt.s32.totalorder %s16_s13, %s16_s13 }
   0x9   :  { %p138_p3 = scmp.ne.s32.totalorder %s16_s13, %s137_s21  ;;  %p143_p5 = scmp.lt.s32.totalorder %s137_s21, %s137_s21 }
   0xb   :  { %p144_p6 = por %p143_p5, %p142_p4 }
   0xd   :  { %p145_p7 = pnand %p144_p6, %p138_p3 }
   0xf   :  { %148 = shalt.err (!%p145_p7)
}
  0x10   :  { %s176_s22 = smov 128   ;;  %s177_s23 = smov 8  }
  0x11   :  { %21 = dma.hbm_to_vmem [thread:$0]  %s235_s0, 256, %s16_s13, [#allocation3], %s176_s22, %s176_s22, %s177_s23  }
  0x12   :  { %171 = dma.done.wait [#allocation3], 256  }
  0x13   :  { %172 = vsyncadd [#allocation3], 4294967040  ;;  %v29_v0 = vld [vmem:[#allocation2] sm:$0xff]  ;;  %v30_v1 = vld [vmem:[#allocation2 + $0x8] sm:$0xff]  ;;  %v44_v2 = vlaneseq  ;;  %s178_s29 = smov [#allocation5]  }
  0x14   :  { %33 = vadd.xlane.f32.xlu0 %v29_v0  ;;  %v113_v31 = vld [vmem:[%s236_s1] ss:$0 sm:$0xff]  ;;  %s101_s30 = sshll.u32 %s178_s29, 4  ;;  %s102_s30 = int_to_ptr.vmem [resolvable:$true] %s101_s30 }
  0x15   :  { %v45_v4 = vand.u32 127, %v44_v2  ;;  %v114_v33 = vld [vmem:[%s237_s2] ss:$0 sm:$0xff]  ;;  %s149_s4 = scalar_lea.vmem %s102_s30, 256  ;;  %p154_p9 = scmp.lt.s32.totalorder %s102_s30, %s102_s30 }
  0x16   :  { %p150_p8 = scmp.ne.s32.totalorder %s102_s30, %s149_s4  ;;  %p155_p10 = scmp.lt.s32.totalorder %s149_s4, %s149_s4 }
  0x17   :  { %vm46_vm0 = vcmp.lt.s32.totalorder %v45_v4, 32 }
  0x18   :  { %35 = vadd.xlane.f32.xlu0 %v30_v1  ;;  %p156_p11 = por %p155_p10, %p154_p9 }
  0x1a   :  { %p157_p12 = pnand %p156_p11, %p150_p8 }
  0xa1   :  { %v34_v3 = vpop.xlane.xlu0 %33 }
  0xa2   :  { %v38_v5 = vmul.f32 0.03125, %v34_v3 }
  0xa4   :  { %v40_v6 = vsub.f32 %v29_v0, %v38_v5 }
  0xa5   :  { %v36_v7 = vpop.xlane.xlu0 %35 }
  0xa6   :  { %v39_v8 = vmul.f32 0.03125, %v36_v7  ;;  %v42_v9 = vmul.f32 %v40_v6, %v40_v6 }
  0xa8   :  { %v41_v10 = vsub.f32 %v30_v1, %v39_v8  ;;  %v49_v11 = vsel %vm46_vm0, %v42_v9, 0.0 }
  0xa9   :  { %51 = vadd.xlane.f32.xlu1 %v49_v11 }
  0xaa   :  { %v43_v12 = vmul.f32 %v41_v10, %v41_v10 }
  0xac   :  { %v50_v13 = vsel %vm46_vm0, %v43_v12, 0.0 }
  0xad   :  { %53 = vadd.xlane.f32.xlu1 %v50_v13 }
 0x136   :  { %v52_v14 = vpop.xlane.xlu1 %51 }
 0x137   :  { %v56_v15 = vmul.f32 0.032258064, %v52_v14 }
 0x139   :  { %119 = vrsqrt.f32 %v56_v15  ;;  %vm60_vm1 = vcmp.eq.f32.partialorder %v56_v15, inf  ;;  %v63_v20 = vand.u32 2147483648, %v56_v15  ;;  %vm62_vm2 = vcmp.eq.f32.partialorder %v56_v15, 0.0 }
 0x13a   :  { %v54_v16 = vpop.xlane.xlu1 %53 }
 0x13b   :  { %v57_v17 = vmul.f32 0.032258064, %v54_v16 }
 0x13d   :  { %121 = vrsqrt.f32 %v57_v17  ;;  %vm67_vm3 = vcmp.eq.f32.partialorder %v57_v17, inf  ;;  %v70_v26 = vand.u32 2147483648, %v57_v17  ;;  %vm69_vm4 = vcmp.eq.f32.partialorder %v57_v17, 0.0 }
 0x143   :  { %v120_v18 = vpop.eup %119 }
 0x144   :  { %v59_v19 = vmul.f32 %v120_v18, %v56_v15 }
 0x146   :  { %v61_v21 = vsel %vm60_vm1, %v56_v15, %v59_v19 }
 0x147   :  { %v122_v22 = vpop.eup %121  ;;  %v64_v23 = vsel %vm62_vm2, %v63_v20, %v61_v21 }
 0x148   :  { %v66_v24 = vmul.f32 %v122_v22, %v57_v17  ;;  %v72_v25 = vadd.f32 1e-06, %v64_v23 }
 0x14a   :  { %v68_v27 = vsel %vm67_vm3, %v57_v17, %v66_v24  ;;  %123 = vrcp.f32 %v72_v25 }
 0x14b   :  { %v71_v28 = vsel %vm69_vm4, %v70_v26, %v68_v27 }
 0x14c   :  { %v73_v29 = vadd.f32 1e-06, %v71_v28 }
 0x14e   :  { %125 = vrcp.f32 %v73_v29 }
 0x154   :  { %v124_v30 = vpop.eup %123 }
 0x155   :  { %v76_v32 = vmul.f32 %v124_v30, %v40_v6 }
 0x157   :  { %v84_v34 = vmul.f32 %v113_v31, %v76_v32 }
 0x158   :  { %v126_v35 = vpop.eup %125 }
 0x159   :  { %v77_v36 = vmul.f32 %v126_v35, %v41_v10  ;;  %v92_v37 = vadd.f32 %v114_v33, %v84_v34 }
 0x15b   :  { %v85_v38 = vmul.f32 %v113_v31, %v77_v36  ;;  %94 = vst [vmem:[#allocation5] sm:$0xff] %v92_v37 }
 0x15d   :  { %v93_v39 = vadd.f32 %v114_v33, %v85_v38 }
 0x15f   :  { %95 = vst [vmem:[#allocation5 + $0x8] sm:$0xff] %v93_v39 }
 0x160   :  { %160 = shalt.err (!%p157_p12)
}
 0x161   :  { %s161_s5 = scalar_lea.hbm %s238_s3, 256 }
 0x162   :  { %p162_p13 = scmp.ne.s32.totalorder %s238_s3, %s161_s5  ;;  %p165_p0 = scmp.lt.u32.totalorder %s161_s5, %s238_s3 }
 0x164   :  { %p167_p1 = pnand %p165_p0, %p162_p13 }
 0x166   :  { %170 = shalt.err (!%p167_p1)
}
 0x167   :  { %107 = dma.vmem_to_hbm [thread:$0]  %s102_s30, 256, %s238_s3, [#allocation4], %s176_s22, %s176_s22, %s177_s23  }
 0x168   :  { %173 = dma.done.wait [#allocation4], 256  }
 0x169   :  { %174 = vsyncadd [#allocation4], 4294967040 }
 0x16a   :  { %111 = vsyncpa [#allocation3], 1 }
 0x16b   :  { %112 = vsyncpa [#allocation4], 1 }

</bundles_post_ra>
